<compile_context>
chip_gen: v7x
topology: tpu7x:2x2x1
jax: 0.10.0
libtpu: 0.0.40
codegen_flags: <defaults>
</compile_context>

<pallas_src>
import jax
import jax.numpy as jnp
from jax.experimental import pallas as pl
from jax.experimental.pallas import tpu as pltpu

COMPUTE_DTYPE = jnp.bfloat16
LANE = 128
SUBLANE = 8
BF16_SUBLANE = 16  # bf16 packs 16 rows per vreg sublane tile


def _round_up(n, m):
    return ((n + m - 1) // m) * m


# --------------------------------------------------------------------------
# Kernel: one batch tile of the fused model per grid step.
# --------------------------------------------------------------------------
def nbeats_fused_kernel(x_ref, w1_ref, b1_ref, w2_ref, b2_ref, w3_ref, b3_ref,
                        o_ref):
    x = x_ref[...]                                                  # (mt, Tinp) bf16

    h1 = jnp.dot(x, w1_ref[...], preferred_element_type=jnp.float32) + b1_ref[...]
    h1 = jnp.maximum(h1, 0.0).astype(COMPUTE_DTYPE)                 # (mt, Hp)

    h2 = jnp.dot(h1, w2_ref[...], preferred_element_type=jnp.float32) + b2_ref[...]
    h2 = jnp.maximum(h2, 0.0).astype(COMPUTE_DTYPE)                 # (mt, Hp)

    # Final matmul against the stacked W3 also performs the sum over blocks.
    o_ref[...] = (jnp.dot(h2, w3_ref[...], preferred_element_type=jnp.float32)
                  + b3_ref[...])                                    # (mt, Op) f32


# --------------------------------------------------------------------------
# Wrapper-side (one-time) parameter packing: concat / block-diag / pad.
# --------------------------------------------------------------------------
def pack_params(params, output_window):
    W1, B1, W2, B2, W3, B3 = params
    nb, tin, hidden = W1.shape
    H = nb * hidden
    Hp = _round_up(H, LANE)
    Op = _round_up(output_window, LANE)
    Tinp = _round_up(tin, BF16_SUBLANE)       # K of the first matmul, bf16-packed

    W1cat = jnp.concatenate([W1[k] for k in range(nb)], axis=1)     # (tin, H)
    b1cat = jnp.concatenate([B1[k] for k in range(nb)], axis=1)     # (1, H)

    W2bd = jnp.zeros((H, H), W2.dtype)                              # block-diagonal
    for k in range(nb):
        W2bd = W2bd.at[k * hidden:(k + 1) * hidden,
                       k * hidden:(k + 1) * hidden].set(W2[k])
    b2cat = jnp.concatenate([B2[k] for k in range(nb)], axis=1)     # (1, H)

    W3cat = jnp.concatenate([W3[k] for k in range(nb)], axis=0)     # (H, out)
    b3sum = jnp.sum(B3, axis=0)                                     # (1, out)

    # Zero-padding is exact: padded input columns hit zero W1 rows, padded
    # activations are ReLU(0 + 0) = 0, padded W2/W3 rows/cols are zero.
    W1p = jnp.zeros((Tinp, Hp), COMPUTE_DTYPE).at[:tin, :H].set(W1cat.astype(COMPUTE_DTYPE))
    b1p = jnp.zeros((1, Hp), jnp.float32).at[:, :H].set(b1cat)
    W2p = jnp.zeros((Hp, Hp), COMPUTE_DTYPE).at[:H, :H].set(W2bd.astype(COMPUTE_DTYPE))
    b2p = jnp.zeros((1, Hp), jnp.float32).at[:, :H].set(b2cat)
    W3p = jnp.zeros((Hp, Op), COMPUTE_DTYPE).at[:H, :output_window].set(W3cat.astype(COMPUTE_DTYPE))
    b3p = jnp.zeros((1, Op), jnp.float32).at[:, :output_window].set(b3sum)
    return (W1p, b1p, W2p, b2p, W3p, b3p)


def _vmem_budget_bytes(mt, tinp, hp, op):
    """Conservative VMEM estimate (weights resident + double-buffered tiles)."""
    weights = tinp * hp * 2 + hp * hp * 2 + hp * op * 2 + 4 * (hp + hp + op)
    tiles = 2 * (mt * tinp * 2 + mt * op * 4)       # x / out, double-buffered
    inter = mt * hp * 8                             # f32 + bf16 intermediates
    est = weights + tiles + inter
    # 2x headroom, clamp to [8 MiB, 48 MiB] so it also fits v7x's 64 MiB VMEM.
    return int(min(max(2 * est, 8 << 20), 48 << 20))


def nbeats_forward(x, packed, output_window, *, m_tile=128):
    """x: (B, input_window, F) float32; packed: output of pack_params.

    m_tile: batch tile; 128 fills the v5e MXU, use 256 on v6e/v7x for the
    taller 256-wide MXU. Clamped to the (padded) batch for small inputs.
    """
    W1p, b1p, W2p, b2p, W3p, b3p = packed
    Tinp, Hp = W1p.shape
    Op = b3p.shape[1]

    inp = x[:, :, -1].astype(COMPUTE_DTYPE)        # glue: last feature channel
    B, tin = inp.shape

    assert m_tile % SUBLANE == 0
    Bp0 = _round_up(B, SUBLANE)
    mt = min(m_tile, Bp0)
    Bp = _round_up(Bp0, mt)
    if (Bp != B) or (Tinp != tin):
        inp = jnp.pad(inp, ((0, Bp - B), (0, Tinp - tin)))

    n_m = Bp // mt

    grid_spec = pltpu.PrefetchScalarGridSpec(
        num_scalar_prefetch=0,
        grid=(n_m,),
        in_specs=[
            pl.BlockSpec((mt, Tinp), lambda i: (i, 0)),   # x: tiled over batch
            pl.BlockSpec((Tinp, Hp), lambda i: (0, 0)),   # weights/biases: DMA once,
            pl.BlockSpec((1, Hp),    lambda i: (0, 0)),   # stay VMEM-resident across
            pl.BlockSpec((Hp, Hp),   lambda i: (0, 0)),   # all grid steps
            pl.BlockSpec((1, Hp),    lambda i: (0, 0)),
            pl.BlockSpec((Hp, Op),   lambda i: (0, 0)),
            pl.BlockSpec((1, Op),    lambda i: (0, 0)),
        ],
        out_specs=pl.BlockSpec((mt, Op), lambda i: (i, 0)),
    )

    out = pl.pallas_call(
        nbeats_fused_kernel,
        out_shape=jax.ShapeDtypeStruct((Bp, Op), jnp.float32),
        grid_spec=grid_spec,
        compiler_params=pltpu.CompilerParams(
            # Batch axis is independent -> shard across TensorCores on v7x.
            dimension_semantics=("parallel",),
            vmem_limit_bytes=_vmem_budget_bytes(mt, Tinp, Hp, Op),
        ),
    )(inp, W1p, b1p, W2p, b2p, W3p, b3p)

    return out[:B, :output_window]


# --------------------------------------------------------------------------
# Init + references
# --------------------------------------------------------------------------
def init_params(key, nb_blocks, input_window, output_window, hidden):
    """Deterministic PyTorch-Linear-style init (uniform +-1/sqrt(fan_in))."""
    ks = jax.random.split(key, 6)

    def u(k, shape, fan_in):
        bound = 1.0 / jnp.sqrt(float(fan_in))
        return jax.random.uniform(k, shape, jnp.float32, -bound, bound)

    W1 = u(ks[0], (nb_blocks, input_window, hidden), input_window)
    B1 = u(ks[1], (nb_blocks, 1, hidden), input_window)
    W2 = u(ks[2], (nb_blocks, hidden, hidden), hidden)
    B2 = u(ks[3], (nb_blocks, 1, hidden), hidden)
    W3 = u(ks[4], (nb_blocks, hidden, output_window), hidden)
    B3 = u(ks[5], (nb_blocks, 1, output_window), hidden)
    return (W1, B1, W2, B2, W3, B3)


def nbeats_ref(x, params):
    """Pure-JAX f32 reference of the PyTorch forward (sum of block MLPs)."""
    W1, B1, W2, B2, W3, B3 = params
    inp = x[:, :, -1]
    y = 0.0
    for k in range(W1.shape[0]):
        h1 = jnp.maximum(inp @ W1[k] + B1[k], 0.0)
        h2 = jnp.maximum(h1 @ W2[k] + B2[k], 0.0)
        y = y + (h2 @ W3[k] + B3[k])
    return y


def nbeats_ref_bf16(x, params):
    """Reference mimicking the kernel's bf16-operand / f32-accumulate math."""
    W1, B1, W2, B2, W3, B3 = params
    q = lambda a: a.astype(jnp.bfloat16).astype(jnp.float32)
    inp = q(x[:, :, -1])
    y = 0.0
    for k in range(W1.shape[0]):
        h1 = jnp.maximum(inp @ q(W1[k]) + B1[k], 0.0)
        h2 = jnp.maximum(q(h1) @ q(W2[k]) + B2[k], 0.0)
        y = y + (q(h2) @ q(W3[k]) + B3[k])
    return y


if __name__ == "__main__":
    # Small, module-consistent shapes.  input_window=20 deliberately exercises
    # the new K-dim (bf16 sublane) padding; m_tile=16 with batch=48 exercises
    # a multi-step (grid=3) batch pipeline while staying small.
    batch = 48
    input_window = 20
    output_window = 8
    num_features = 4
    layer_width = 32
    nb_blocks = 3

    key = jax.random.PRNGKey(0)
    k_x, k_p = jax.random.split(key)
    x = jax.random.normal(k_x, (batch, input_window, num_features), jnp.float32)
    params = init_params(k_p, nb_blocks, input_window, output_window, layer_width)
    packed = pack_params(params, output_window)

    out = nbeats_forward(x, packed, output_window, m_tile=16)
    out = jax.block_until_ready(out)

    ref_bf16 = nbeats_ref_bf16(x, params)
    ref_f32 = nbeats_ref(x, params)

    assert out.shape == (batch, output_window)
    assert jnp.allclose(out, ref_bf16, atol=1e-2, rtol=1e-2), "mismatch vs bf16 reference"
    assert jnp.allclose(out, ref_f32, atol=5e-2, rtol=5e-2), "mismatch vs f32 reference"

    print("KERNEL_OK")
</pallas_src>

<mosaic_0001>
module attributes {stable_mosaic.version = 11 : i64} {
  func.func @nbeats_fused_kernel(%arg0: i32, %arg1: memref<16x32xbf16, #tpu.memory_space<vmem>>, %arg2: memref<32x128xbf16, #tpu.memory_space<vmem>>, %arg3: memref<1x128xf32, #tpu.memory_space<vmem>>, %arg4: memref<128x128xbf16, #tpu.memory_space<vmem>>, %arg5: memref<1x128xf32, #tpu.memory_space<vmem>>, %arg6: memref<128x128xbf16, #tpu.memory_space<vmem>>, %arg7: memref<1x128xf32, #tpu.memory_space<vmem>>, %arg8: memref<16x128xf32, #tpu.memory_space<vmem>>) attributes {dimension_semantics = [#tpu.dimension_semantics<parallel>], iteration_bounds = array<i64: 3>, scalar_prefetch = 0 : i64, scratch_operands = 0 : i64, tpu.core_type = #tpu.core_type<tc>, window_params = [{transform_indices = @transform_0, window_bounds = array<i64: 16, 32>}, {pipeline_mode = #tpu.pipeline_mode<synchronous>, transform_indices = @transform_1, window_bounds = array<i64: 32, 128>}, {pipeline_mode = #tpu.pipeline_mode<synchronous>, transform_indices = @transform_2, window_bounds = array<i64: 1, 128>}, {pipeline_mode = #tpu.pipeline_mode<synchronous>, transform_indices = @transform_3, window_bounds = array<i64: 128, 128>}, {pipeline_mode = #tpu.pipeline_mode<synchronous>, transform_indices = @transform_4, window_bounds = array<i64: 1, 128>}, {pipeline_mode = #tpu.pipeline_mode<synchronous>, transform_indices = @transform_5, window_bounds = array<i64: 128, 128>}, {pipeline_mode = #tpu.pipeline_mode<synchronous>, transform_indices = @transform_6, window_bounds = array<i64: 1, 128>}, {transform_indices = @transform_7, window_bounds = array<i64: 16, 128>}]} {
    %c0 = arith.constant 0 : index
    %c0_0 = arith.constant 0 : index
    %0 = vector.load %arg1[%c0, %c0_0] : memref<16x32xbf16, #tpu.memory_space<vmem>>, vector<16x32xbf16>
    %c0_1 = arith.constant 0 : index
    %c0_2 = arith.constant 0 : index
    %1 = vector.load %arg2[%c0_1, %c0_2] : memref<32x128xbf16, #tpu.memory_space<vmem>>, vector<32x128xbf16>
    %cst = arith.constant dense<0.000000e+00> : vector<16x128xf32>
    %2 = tpu.matmul %0, %1, %cst {dimension_numbers = #tpu.dot_dimension_numbers<[1], [0], [0], [1], [0, 0, 1, 1], [], []>} : vector<16x32xbf16>, vector<32x128xbf16>, vector<16x128xf32> -> vector<16x128xf32>
    %c0_3 = arith.constant 0 : index
    %c0_4 = arith.constant 0 : index
    %3 = vector.load %arg3[%c0_3, %c0_4] : memref<1x128xf32, #tpu.memory_space<vmem>>, vector<1x128xf32>
    %4 = vector.broadcast %3 : vector<1x128xf32> to vector<16x128xf32>
    %5 = arith.addf %2, %4 : vector<16x128xf32>
    %cst_5 = arith.constant 0.000000e+00 : f32
    %6 = vector.broadcast %cst_5 : f32 to vector<16x128xf32>
    %7 = arith.maximumf %5, %6 : vector<16x128xf32>
    %8 = arith.truncf %7 : vector<16x128xf32> to vector<16x128xbf16>
    %c0_6 = arith.constant 0 : index
    %c0_7 = arith.constant 0 : index
    %9 = vector.load %arg4[%c0_6, %c0_7] : memref<128x128xbf16, #tpu.memory_space<vmem>>, vector<128x128xbf16>
    %cst_8 = arith.constant dense<0.000000e+00> : vector<16x128xf32>
    %10 = tpu.matmul %8, %9, %cst_8 {dimension_numbers = #tpu.dot_dimension_numbers<[1], [0], [0], [1], [0, 0, 1, 1], [], []>} : vector<16x128xbf16>, vector<128x128xbf16>, vector<16x128xf32> -> vector<16x128xf32>
    %c0_9 = arith.constant 0 : index
    %c0_10 = arith.constant 0 : index
    %11 = vector.load %arg5[%c0_9, %c0_10] : memref<1x128xf32, #tpu.memory_space<vmem>>, vector<1x128xf32>
    %12 = vector.broadcast %11 : vector<1x128xf32> to vector<16x128xf32>
    %13 = arith.addf %10, %12 : vector<16x128xf32>
    %cst_11 = arith.constant 0.000000e+00 : f32
    %14 = vector.broadcast %cst_11 : f32 to vector<16x128xf32>
    %15 = arith.maximumf %13, %14 : vector<16x128xf32>
    %16 = arith.truncf %15 : vector<16x128xf32> to vector<16x128xbf16>
    %c0_12 = arith.constant 0 : index
    %c0_13 = arith.constant 0 : index
    %17 = vector.load %arg6[%c0_12, %c0_13] : memref<128x128xbf16, #tpu.memory_space<vmem>>, vector<128x128xbf16>
    %cst_14 = arith.constant dense<0.000000e+00> : vector<16x128xf32>
    %18 = tpu.matmul %16, %17, %cst_14 {dimension_numbers = #tpu.dot_dimension_numbers<[1], [0], [0], [1], [0, 0, 1, 1], [], []>} : vector<16x128xbf16>, vector<128x128xbf16>, vector<16x128xf32> -> vector<16x128xf32>
    %c0_15 = arith.constant 0 : index
    %c0_16 = arith.constant 0 : index
    %19 = vector.load %arg7[%c0_15, %c0_16] : memref<1x128xf32, #tpu.memory_space<vmem>>, vector<1x128xf32>
    %20 = vector.broadcast %19 : vector<1x128xf32> to vector<16x128xf32>
    %21 = arith.addf %18, %20 : vector<16x128xf32>
    %c0_17 = arith.constant 0 : index
    %c0_18 = arith.constant 0 : index
    %22 = vector.load %arg8[%c0_17, %c0_18] : memref<16x128xf32, #tpu.memory_space<vmem>>, vector<16x128xf32>
    tpu.vector_store %arg8[%c0_17, %c0_18], %21 {strides = array<i32>} : memref<16x128xf32, #tpu.memory_space<vmem>>, vector<16x128xf32>,
    return
  }
  func.func @transform_0(%arg0: i32) -> (i32, i32) {
    %c0_i32 = arith.constant 0 : i32
    %c0_i32_0 = arith.constant 0 : i32
    return %arg0, %c0_i32 : i32, i32
  }
  func.func @transform_1(%arg0: i32) -> (i32, i32) {
    %c0_i32 = arith.constant 0 : i32
    %c0_i32_0 = arith.constant 0 : i32
    %c0_i32_1 = arith.constant 0 : i32
    return %c0_i32, %c0_i32_0 : i32, i32
  }
  func.func @transform_2(%arg0: i32) -> (i32, i32) {
    %c0_i32 = arith.constant 0 : i32
    %c0_i32_0 = arith.constant 0 : i32
    %c0_i32_1 = arith.constant 0 : i32
    return %c0_i32, %c0_i32_0 : i32, i32
  }
  func.func @transform_3(%arg0: i32) -> (i32, i32) {
    %c0_i32 = arith.constant 0 : i32
    %c0_i32_0 = arith.constant 0 : i32
    %c0_i32_1 = arith.constant 0 : i32
    return %c0_i32, %c0_i32_0 : i32, i32
  }
  func.func @transform_4(%arg0: i32) -> (i32, i32) {
    %c0_i32 = arith.constant 0 : i32
    %c0_i32_0 = arith.constant 0 : i32
    %c0_i32_1 = arith.constant 0 : i32
    return %c0_i32, %c0_i32_0 : i32, i32
  }
  func.func @transform_5(%arg0: i32) -> (i32, i32) {
    %c0_i32 = arith.constant 0 : i32
    %c0_i32_0 = arith.constant 0 : i32
    %c0_i32_1 = arith.constant 0 : i32
    return %c0_i32, %c0_i32_0 : i32, i32
  }
  func.func @transform_6(%arg0: i32) -> (i32, i32) {
    %c0_i32 = arith.constant 0 : i32
    %c0_i32_0 = arith.constant 0 : i32
    %c0_i32_1 = arith.constant 0 : i32
    return %c0_i32, %c0_i32_0 : i32, i32
  }
  func.func @transform_7(%arg0: i32) -> (i32, i32) {
    %c0_i32 = arith.constant 0 : i32
    %c0_i32_0 = arith.constant 0 : i32
    return %arg0, %c0_i32 : i32, i32
  }
}

</mosaic_0001>

<bundles_post_ra>
// kernel: tpu_custom_call.1
= control target key start
LH: loop header
LB: loop body
LE: loop exit
PB: predicated region body
PF: predicated region fallthrough
CT: control target
= control target key end

     0   :  { %12 = vsyncpa [#allocation3], 0  ;;  %s1300_s0 = inlined_call_operand.vmem [shape: bf16[48,32], index: 0, kind: input, shape index: {}]   ;;  %s1301_s1 = inlined_call_operand.vmem [shape: bf16[32,128], index: 1, kind: input, shape index: {}]   ;;  %s1302_s2 = inlined_call_operand.vmem [shape: f32[1,128], index: 2, kind: input, shape index: {}]   ;;  %s1303_s3 = inlined_call_operand.hbm [shape: bf16[128,128], index: 3, kind: input, shape index: {}]   ;;  %s1304_s4 = inlined_call_operand.vmem [shape: f32[1,128], index: 4, kind: input, shape index: {}]   ;;  %s1305_s5 = inlined_call_operand.hbm [shape: bf16[128,128], index: 5, kind: input, shape index: {}]   ;;  %s1306_s6 = inlined_call_operand.vmem [shape: f32[1,128], index: 6, kind: input, shape index: {}]   ;;  %s1307_s7 = inlined_call_operand.hbm [shape: f32[48,128], index: 7, kind: output, shape index: {}]  }
   0x1   :  { %13 = vsyncpa [#allocation6], 0 }
   0x2   :  { %14 = vsyncpa [#allocation4], 0 }
   0x3   :  { %16 = vsyncpa [#allocation4 + $0x1], 0  ;;  %s1087_s24 = smov 0   ;;  %s1089_s25 = smov 0  }
   0x4   :  { %s1091_s26 = smov 0   ;;  %s1093_s27 = smov 0  }
   0x5 LB: > { %s1108_s28 = sadd.s32 4294967295, %s1036_s27   ;;  %s716_s29 = sadd.s32 4294967294, %s1036_s27   ;;  %s1036_s27 = sphi %s1093_s27, %s1327_s27   ;;  %s1032_s26 = sphi %s1091_s26, %s1326_s26   ;;  %s1028_s25 = sphi %s1089_s25, %s1325_s25   ;;  %s1024_s24 = sphi %s1087_s24, %s1324_s24  }
   0x6   : > { %s1112_s30 = sadd.s32 1, %s1036_s27   ;;  %s181_s8 = sadd.s32 1, %s1032_s26 }
   0x7   : > { %s178_s9 = ssub.s32 %s1036_s27, %s1112_s30  ;;  %p191_p0 = scmp.ne.s32.totalorder %s1032_s26, %s1028_s25 }
   0x8   : > { %p179_p1 = scmp.eq.s32.totalorder %s178_s9, 0  ;;  %p192_p2 = scmp.eq.s32.totalorder %s1108_s28, 2 }
   0x9   : > { %p197_p3 = scmp.ne.s32.totalorder %s1028_s25, %s1024_s24  ;;  %p198_p4 = scmp.eq.s32.totalorder %s716_s29, 2 }
   0xa   : > { %s1123_s10 = scalar_select %p179_p1, %s1032_s26, %s181_s8  }
   0xb   : > { %p1125_p5 = por %p192_p2, %p191_p0  ;;  %p1129_p6 = por %p198_p4, %p197_p3 }
   0xc   : > { %1311 = sst [smem:[#allocation11_spill]] %s1123_s10  ;;  %p717_p7 = scmp.ge.s32.totalorder %s1036_s27, 1 }
   0xd   : > { %s1312_s11 = scalar_select %p1125_p5, 1, 0 }
   0xe   : > { %s1313_s12 = scalar_select %p1129_p6, 1, 0 }
   0xf   : > { %p205_p8 = scmp.lt.s32.totalorder %s1036_s27, 4  ;;  %p1308_p9 = scmp.eq.s32.totalorder %s1108_s28, 0 }
  0x10   : > { %s1038_s14 = smov [#allocation2]   ;;  %s1039_s17 = smov [#allocation5]  }
  0x11   : > { %p1136_p10 = pnand %p717_p7, %p205_p8  ;;  %s223_s15 = sshll.u32 %s1038_s14, 4  ;;  %s224_s15 = int_to_ptr.vmem [resolvable:$true] %s223_s15 }
  0x12   : > { %s239_s18 = sshll.u32 %s1039_s17, 4  ;;  %s910_s21 = scalar_lea.hbm %s1303_s3, 1024  ;;  %s1148_s18 = int_to_ptr.vmem [resolvable:$true] %s239_s18 }
  0x13   : > { %s1314_s13 = scalar_select %p1136_p10, 1, 0 }
  0x14   : > { %p835_p11 = pneg %p1136_p10  ;;  %p911_p13 = scmp.ne.s32.totalorder %s1303_s3, %s910_s21 }
  0x15   : > { %p917_p3 = scmp.lt.u32.totalorder %s910_s21, %s1303_s3 }
  0x16   : > { %p1144_p12 = pnand %p1308_p9, %p835_p11 }
  0x18   : > { %p912_p0 = pneg %p1144_p12 }
  0x1a   : > { %p913_p1 = pnand %p912_p0, %p911_p13 }
  0x1c   : > { %p914_p2 = pneg %p913_p1 }
  0x1e   : > { %p919_p4 = pnand %p917_p3, %p914_p2 }
  0x20   : > { %922 = shalt.err (!%p919_p4)
}
  0x21   : > { %s923_s9 = scalar_lea.vmem %s224_s15, 1024  ;;  %p931_p9 = scmp.lt.s32.totalorder %s224_s15, %s224_s15 }
  0x22   : > { %p924_p7 = scmp.ne.s32.totalorder %s224_s15, %s923_s9  ;;  %p932_p6 = scmp.lt.s32.totalorder %s923_s9, %s923_s9 }
  0x24   : > { %p926_p8 = pnand %p924_p7, %p912_p0  ;;  %p933_p5 = por %p932_p6, %p931_p9 }
  0x26   : > { %p927_p11 = pneg %p926_p8 }
  0x28   : > { %p934_p10 = pnand %p933_p5, %p927_p11 }
  0x2a   : > { %937 = shalt.err (!%p934_p10)
}
  0x2b   : > { %s1040_s14 = smov 64   ;;  %s1041_s17 = smov 4  }
  0x2c   : > { %838 = dma.hbm_to_vmem [thread:$0]  (!%p1144_p12), %s1303_s3, 1024, %s224_s15, [#allocation3], %s1040_s14, %s1040_s14, %s1041_s17  }
  0x2d   : > { %s938_s23 = scalar_lea.hbm %s1305_s5, 1024 }
  0x2e   : > { %p939_p13 = scmp.ne.s32.totalorder %s1305_s5, %s938_s23  ;;  %p945_p9 = scmp.lt.u32.totalorder %s938_s23, %s1305_s5 }
  0x30   : > { %p941_p5 = pnand %p939_p13, %p912_p0 }
  0x32   : > { %p942_p6 = pneg %p941_p5 }
  0x34   : > { %p947_p10 = pnand %p945_p9, %p942_p6 }
  0x36   : > { %950 = shalt.err (!%p947_p10)
}
  0x37   : > { %s951_s15 = scalar_lea.vmem %s1148_s18, 1024  ;;  %p959_p4 = scmp.lt.s32.totalorder %s1148_s18, %s1148_s18 }
  0x38   : > { %p952_p1 = scmp.ne.s32.totalorder %s1148_s18, %s951_s15  ;;  %p960_p7 = scmp.lt.s32.totalorder %s951_s15, %s951_s15 }
  0x3a   : > { %p954_p2 = pnand %p952_p1, %p912_p0  ;;  %p961_p8 = por %p960_p7, %p959_p4 }
  0x3c   : > { %p955_p3 = pneg %p954_p2 }
  0x3e   : > { %p962_p11 = pnand %p961_p8, %p955_p3 }
  0x40   : > { %965 = shalt.err (!%p962_p11)
}
  0x41   : > { %841 = dma.hbm_to_vmem [thread:$0]  (!%p1144_p12), %s1305_s5, 1024, %s1148_s18, [#allocation6], %s1040_s14, %s1040_s14, %s1041_s17  }
  0x42   : > { %p1316_p13 = scmp.ne.s32.totalorder %s1314_s13, 0 }
  0x43   : > { %p1317_p5 = scmp.eq.s32.totalorder (!%p1316_p13), %s1108_s28, 0 }
  0x44   : > { %267 = sbr.rel (%p1316_p13) target bundleno = 761 (0x2f9), region = 48 }
  0x4b   : > { %1011 = dma.done.wait (%p1317_p5), [#allocation3], 1024   ;;  %p1318_p0 = pmov %p1317_p5 }
  0x4d   : > { %1013 = vsyncadd (%p1318_p0), [#allocation3], 4294966272  ;;  %p1319_p6 = pmov %p1318_p0 }
  0x4e   : > { %p1320_p9 = pmov %p1318_p0 }
  0x4f   : > { %1015 = dma.done.wait (%p1319_p6), [#allocation6], 1024  }
  0x50   : > { %1017 = vsyncadd (%p1320_p9), [#allocation6], 4294966272  ;;  %s725_s16 = sshll.u32 %s1108_s28, 1  ;;  %v1042_v0 = vmov 0.0   ;;  %vm1043_vm0 = vmmov 0   ;;  %v891_v1 = vld [vmem:[%s1301_s1] sm:$0xff]  }
  0x51   : > { %777 = vmatprep.subr.bf16.mxu0 %v1042_v0  ;;  %781 = vmatprep.mubr.msk.bf16.mxu0 %vm1043_vm0, %v1042_v0  ;;  %p304_p12 = scmp.lt.s32.totalorder %s725_s16, 5  ;;  %v892_v2 = vld [vmem:[%s1301_s1 + $0x8] sm:$0xff]   ;;  %v894_v3 = vld [vmem:[#allocation2] sm:$0xff]   ;;  %vm341_vm1 = vcmask 261120   ;;  %v896_v6 = vld [vmem:[#allocation2 + $0x10] sm:$0xff]   ;;  %s300_s10 = sand.u32 1, %s1028_s25  }
  0x52   : > { %785 = vmatprep.subr.bf16.mxu1 %v1042_v0  ;;  %801 = vmatprep.mubr.msk.bf16.mxu1 %vm1043_vm0, %v1042_v0  ;;  %v895_v5 = vld [vmem:[#allocation2 + $0x8] sm:$0xff]   ;;  %v897_v7 = vld [vmem:[#allocation2 + $0x18] sm:$0xff]   ;;  %v898_v8 = vld [vmem:[#allocation2 + $0x20] sm:$0xff]   ;;  %s724_s19 = sshll.u32 %s300_s10, 4  ;;  %s755_s17 = sshll.u32 %s1108_s28, 8 }
  0x53   : > { %s1329_s16 = smov (!%p304_p12, %s725_s16), 5  ;;  %778 = vmatpush3.bf16.msra.mxu0 %v891_v1  ;;  %786 = vmatpush3.bf16.msra.mxu1 %v894_v3  ;;  %v899_v9 = vld [vmem:[#allocation2 + $0x28] sm:$0xff]   ;;  %v900_v10 = vld [vmem:[#allocation2 + $0x30] sm:$0xff]   ;;  %v901_v11 = vld [vmem:[#allocation2 + $0x38] sm:$0xff]   ;;  %s302_s18 = scalar_lea.vmem [#allocation7], %s724_s19 }
  0x54   : > { %s726_s13 = sshll.u32 %s1329_s16, 2  ;;  %779 = vmatprep.subr.bf16.mxu0 %v1042_v0  ;;  %787 = vmatprep.subr.bf16.mxu1 %v1042_v0  ;;  %v902_v12 = vld [vmem:[#allocation5] sm:$0xff]   ;;  %v903_v13 = vld [vmem:[#allocation5 + $0x8] sm:$0xff]   ;;  %v904_v14 = vld [vmem:[#allocation5 + $0x10] sm:$0xff]   ;;  %s632_s14 = sshll.u32 %s302_s18, 4  ;;  %s1252_s14 = int_to_ptr.vmem [resolvable:$true] %s632_s14 }
  0x55   : > { %s307_s21 = scalar_lea.vmem %s1300_s0, %s726_s13  ;;  %v905_v15 = vld [vmem:[#allocation5 + $0x18] sm:$0xff]   ;;  %v906_v16 = vld [vmem:[#allocation5 + $0x20] sm:$0xff]   ;;  %v907_v17 = vld [vmem:[#allocation5 + $0x28] sm:$0xff]   ;;  %s1257_s22 = scalar_lea.hbm %s1307_s7, %s755_s17 }
  0x56   : > { %v893_v4 = vld [vmem:[%s307_s21] sm:$0xff]   ;;  %v908_v28 = vld [vmem:[#allocation5 + $0x30] sm:$0xff]   ;;  %v909_v29 = vld [vmem:[#allocation5 + $0x38] sm:$0xff]   ;;  %s1259_s23 = scalar_lea.sflag [#allocation4], %s300_s10  ;;  %s966_s28 = scalar_lea.vmem %s1252_s14, 256 }
  0x57   : > { %780 = vmatpush3.bf16.msra.mxu0 %v892_v2  ;;  %788 = vmatpush3.bf16.msra.mxu1 %v895_v5  ;;  %v727_v18 = vld [vmem:[%s1302_s2] ss:$0 sm:$0xff]  ;;  %p967_p10 = scmp.ne.s32.totalorder %s1252_s14, %s966_s28  ;;  %p1321_p1 = scmp.ne.s32.totalorder %s1312_s11, 0 }
  0x58   : > { %805 = vmatprep.subr.bf16.mxu0 %v1042_v0  ;;  %789 = vmatprep.subr.bf16.mxu1 %v1042_v0  ;;  %v732_v30 = vld [vmem:[%s1304_s4] ss:$0 sm:$0xff]  ;;  %s1044_s29 = smov [#allocation7]  }
  0x59   : > { %v741_v40 = vld [vmem:[%s1306_s6] ss:$0 sm:$0xff]  ;;  %p968_p2 = pnand %p967_p10, %p1321_p1  ;;  %s970_s8 = sshll.u32 %s1044_s29, 4  ;;  %s971_s8 = int_to_ptr.vmem [resolvable:$false] %s970_s8 }
  0x5a   : > { %782 = vmatmul.mubr.msk.bf16.vlgmr.msra.gmra.mrb[0].mxu0 %vm341_vm1, %v893_v4  ;;  %s972_s9 = scalar_lea.vmem %s971_s8, 512  ;;  %p973_p4 = scmp.lt.s32.totalorder %s1252_s14, %s971_s8 }
  0x5b   : > { %821 = vmatprep.mubr.msk.bf16.mxu0 %vm1043_vm0, %v1042_v0  ;;  %790 = vmatpush3.bf16.msra.mxu1 %v896_v6  ;;  %p969_p3 = pneg %p968_p2  ;;  %p974_p7 = scmp.lt.s32.totalorder %s972_s9, %s966_s28 }
  0x5c   : > { %791 = vmatprep.subr.bf16.mxu1 %v1042_v0  ;;  %806 = vmatpush3.bf16.msra.mxu0 %v902_v12 }
  0x5d   : > { %807 = vmatprep.subr.bf16.mxu0 %v1042_v0  ;;  %p975_p8 = por %p974_p7, %p973_p4 }
  0x5f   : > { %792 = vmatpush3.bf16.msra.mxu1 %v897_v7  ;;  %p976_p11 = pnand %p975_p8, %p969_p3 }
  0x60   : > { %793 = vmatprep.subr.bf16.mxu1 %v1042_v0  ;;  %808 = vmatpush3.bf16.msra.mxu0 %v903_v13 }
  0x61   : > { %809 = vmatprep.subr.bf16.mxu0 %v1042_v0 }
  0x63   : > { %794 = vmatpush3.bf16.msra.mxu1 %v898_v8 }
  0x64   : > { %795 = vmatprep.subr.bf16.mxu1 %v1042_v0  ;;  %810 = vmatpush3.bf16.msra.mxu0 %v904_v14 }
  0x65   : > { %811 = vmatprep.subr.bf16.mxu0 %v1042_v0 }
  0x67   : > { %796 = vmatpush3.bf16.msra.mxu1 %v899_v9 }
  0x68   : > { %797 = vmatprep.subr.bf16.mxu1 %v1042_v0  ;;  %812 = vmatpush3.bf16.msra.mxu0 %v905_v15 }
  0x69   : > { %813 = vmatprep.subr.bf16.mxu0 %v1042_v0 }
  0x6b   : > { %798 = vmatpush3.bf16.msra.mxu1 %v900_v10 }
  0x6c   : > { %799 = vmatprep.subr.bf16.mxu1 %v1042_v0  ;;  %814 = vmatpush3.bf16.msra.mxu0 %v906_v16 }
  0x6d   : > { %815 = vmatprep.subr.bf16.mxu0 %v1042_v0 }
  0x6f   : > { %800 = vmatpush3.bf16.msra.mxu1 %v901_v11 }
  0x70   : > { %816 = vmatpush3.bf16.msra.mxu0 %v907_v17 }
  0x71   : > { %817 = vmatprep.subr.bf16.mxu0 %v1042_v0 }
  0x74   : > { %818 = vmatpush3.bf16.msra.mxu0 %v908_v28 }
  0x75   : > { %819 = vmatprep.subr.bf16.mxu0 %v1042_v0 }
  0x78   : > { %820 = vmatpush3.bf16.msra.mxu0 %v909_v29 }
 0x12d   : > { %v379_v19 = vpop.f32.mrb[0].mxu0 }
 0x12e   : > { %v380_v20 = vadd.f32 %v727_v18, %v379_v19  ;;  %v783_v21 = vpop.f32.mrb[1].mxu0 }
 0x12f   : > { %v382_v22 = vpop.f32.mrb[2].mxu0 }
 0x130   : > { %v383_v23 = vadd.f32 %v727_v18, %v382_v22  ;;  %v784_v24 = vpop.f32.mrb[3].mxu0  ;;  %v386_v25 = vmax.f32 %v380_v20, 0.0 }
 0x132   : > { %v387_v26 = vmax.f32 %v383_v23, 0.0 }
 0x134   : > { %v388_v27 = vpack.c.bf16 %v387_v26, %v386_v25 }
 0x136   : > { %802 = vmatmul.mubr.bf16.vlgmr.msra.gmra.mrb[0].mxu1 %v388_v27 }
 0x209   : > { %v494_v31 = vpop.f32.mrb[0].mxu1 }
 0x20a   : > { %v495_v32 = vadd.f32 %v732_v30, %v494_v31  ;;  %v803_v33 = vpop.f32.mrb[1].mxu1 }
 0x20b   : > { %v497_v34 = vpop.f32.mrb[2].mxu1 }
 0x20c   : > { %v498_v35 = vadd.f32 %v732_v30, %v497_v34  ;;  %v804_v36 = vpop.f32.mrb[3].mxu1  ;;  %v501_v37 = vmax.f32 %v495_v32, 0.0 }
 0x20e   : > { %v502_v38 = vmax.f32 %v498_v35, 0.0 }
 0x210   : > { %v503_v39 = vpack.c.bf16 %v502_v38, %v501_v37 }
 0x212   : > { %822 = vmatmul.mubr.bf16.vlgmr.msra.gmra.mrb[4].mxu0 %v503_v39 }
 0x2e5   : > { %v609_v41 = vpop.f32.mrb[4].mxu0 }
 0x2e6   : > { %v610_v42 = vadd.f32 %v741_v40, %v609_v41  ;;  %v823_v43 = vpop.f32.mrb[5].mxu0 }
 0x2e7   : > { %v612_v44 = vpop.f32.mrb[6].mxu0 }
 0x2e8   : > { %616 = vst [vmem:[%s302_s18] sm:$0xff] %v610_v42  ;;  %v613_v45 = vadd.f32 %v741_v40, %v612_v44  ;;  %v824_v46 = vpop.f32.mrb[7].mxu0 }
 0x2ea   : > { %617 = vst [vmem:[%s302_s18 + $0x8] sm:$0xff] %v613_v45 }
 0x2eb   : > { %979 = shalt.err (!%p976_p11)
}
 0x2ec   : > { %s980_s15 = scalar_lea.hbm %s1257_s22, 256  ;;  %s984_s16 = scalar_lea.hbm %s1307_s7, 768 }
 0x2ed   : > { %p981_p13 = scmp.ne.s32.totalorder %s1257_s22, %s980_s15  ;;  %p985_p6 = scmp.lt.u32.totalorder %s1257_s22, %s1307_s7 }
 0x2ee   : > { %p986_p9 = scmp.lt.u32.totalorder %s984_s16, %s980_s15  ;;  %p988_p10 = scmp.lt.u32.totalorder %s980_s15, %s1257_s22 }
 0x2ef   : > { %p982_p5 = pnand %p981_p13, %p1321_p1 }
 0x2f0   : > { %p987_p12 = por %p986_p9, %p985_p6 }
 0x2f1   : > { %p983_p0 = pneg %p982_p5 }
 0x2f2   : > { %p989_p2 = por %p988_p10, %p987_p12 }
 0x2f4   : > { %p990_p3 = pnand %p989_p2, %p983_p0 }
 0x2f6   : > { %993 = shalt.err (!%p990_p3)
}
 0x2f7   : > { %s1045_s17 = smov 128   ;;  %s1046_s20 = smov 8  }
 0x2f8   : > { %833 = dma.vmem_to_hbm [thread:$0]  (%p1321_p1), %s1252_s14, 256, %s1257_s22, %s1259_s23, %s1045_s17, %s1045_s17, %s1046_s20  }
 0x2f9 PF: > { %p850_p4 = scmp.ge.s32.totalorder %s1036_s27, 2  ;;  %s647_s21 = sand.u32 1, %s1024_s24  }
 0x2fa   : > { %p1322_p7 = scmp.ne.s32.totalorder %s1313_s12, 0  ;;  %s648_s28 = scalar_lea.sflag [#allocation4], %s647_s21 }
 0x2fc   : > { %p843_p8 = pnand %p850_p4, %p1322_p7 }
 0x2fe   : > { %1019 = dma.done.wait (!%p843_p8), %s648_s28, 256  }
 0x2ff   : > { %1021 = vsyncadd (!%p843_p8), %s648_s28, 4294967040  ;;  %s1323_s29 = sld [smem:[#allocation11_spill]]  ;;  %p19_p11 = scmp.ge.s32.totalorder %s1112_s30, 5  }
 0x300   : > { %s1324_s24 = smov %s1028_s25  ;;  %s1325_s25 = smov %s1032_s26 }
 0x301   : > { %s1327_s27 = smov %s1112_s30  ;;  %21 = sbr.rel (!%p19_p11) target bundleno = 5 (0x5), region = 92 }
 0x305   : > { %s1326_s26 = smov %s1323_s29 }
 0x308   :  { %653 = vsyncpa [#allocation3], 1 }
 0x309   :  { %655 = vsyncpa [#allocation3 + $0x1], 1 }
 0x30a   :  { %656 = vsyncpa [#allocation6], 1 }
 0x30b   :  { %657 = vsyncpa [#allocation4], 1 }
 0x30c   :  { %659 = vsyncpa [#allocation4 + $0x1], 1 }

</bundles_post_ra>
